<compile_context>
chip_gen: v6e
topology: v6e:2x2x1
jax: 0.10.0
libtpu: 0.0.40
codegen_flags: <defaults>
</compile_context>

<pallas_src>
import jax
import jax.numpy as jnp
import numpy as np
from jax import lax
from jax.experimental import pallas as pl
from jax.experimental.pallas import tpu as pltpu


def _cdiv(a: int, b: int) -> int:
    return -(-a // b)


def _round_up(a: int, b: int) -> int:
    return _cdiv(a, b) * b


def _resized_shape(H: int, W: int, th: int, tw: int):
    """Static resize decision mirroring the torch module (PIL img.size == (W, H))."""
    # TODO(synk): torchvision's functional.resize uses its own rounding of the aspect-preserved
    # edge; int(round(.)) may differ by one pixel for some aspect ratios.
    if W < tw or H < th:
        s = max(th, tw)
        if H <= W:                       # smaller edge (H) -> s, keep aspect ratio
            return s, max(s, int(round(s * W / H)))
        return max(s, int(round(s * H / W))), s
    return H, W


def _bilinear_weight_matrix(in_size: int, out_size: int) -> jnp.ndarray:
    """(out_size, in_size) bilinear interpolation matrix, align_corners=False."""
    # TODO(synk): antialias filtering (only relevant for downscaling) is not implemented;
    # this module's resize path only ever upsamples, where antialias is a no-op.
    if in_size == out_size:
        return jnp.eye(out_size, dtype=jnp.float32)
    dst = jnp.arange(out_size, dtype=jnp.float32)
    src = (dst + 0.5) * (in_size / out_size) - 0.5
    src = jnp.clip(src, 0.0, float(in_size - 1))
    lo = jnp.floor(src).astype(jnp.int32)
    hi = jnp.minimum(lo + 1, in_size - 1)
    w_hi = src - lo.astype(jnp.float32)
    w_lo = 1.0 - w_hi
    rows = jnp.arange(out_size)
    w = jnp.zeros((out_size, in_size), jnp.float32)
    w = w.at[rows, lo].add(w_lo)
    w = w.at[rows, hi].add(w_hi)
    return w


def _crop_offsets(Hn: int, Wn: int, th: int, tw: int, key):
    k_top, k_left = jax.random.split(key)
    top = jax.random.randint(k_top, (), 0, Hn - th + 1)
    left = jax.random.randint(k_left, (), 0, Wn - tw + 1)
    return top, left


def _vmem_tile_bytes(rows: int, cols: int, itemsize: int) -> int:
    """VMEM footprint of a (rows, cols) tile: sublane pad (8/16/32 for 4/2/1-byte dtypes),
    lane pad to 128."""
    sub = max(8, 32 // max(1, itemsize))
    return _round_up(rows, sub) * _round_up(cols, 128) * itemsize


def _chip_config():
    """(per-step VMEM block budget in bytes, vmem_limit_bytes or None)."""
    try:
        kind = jax.devices()[0].device_kind.lower()
    except Exception:
        kind = ""
    if "v5 lite" in kind or "v5e" in kind or "v5lite" in kind or "v6" in kind:
        return 64 * 2**20, 100 * 2**20        # 128 MiB physical VMEM
    if "v7" in kind or "7x" in kind:
        return 24 * 2**20, 40 * 2**20         # 64 MiB physical VMEM per TensorCore
    return 10 * 2**20, None                   # unknown chip: stay under the default limit


def resize_and_crop(x: jnp.ndarray, target_size: tuple, key, *,
                    compute_dtype=jnp.bfloat16) -> jnp.ndarray:
    """x: (N, C, H, W).  target_size: (th, tw).  Returns (N, C, th, tw)."""
    th, tw = int(target_size[0]), int(target_size[1])
    N, C, H, W = x.shape
    Hn, Wn = _resized_shape(H, W, th, tw)
    assert Hn >= th and Wn >= tw, "resized image must cover the crop"

    # RandomCrop offsets (deterministic from key, shared across the batch).
    top, left = _crop_offsets(Hn, Wn, th, tw, key)

    if Hn == H and Wn == W:
        # Fast path: pure random crop.  A windowed slice reads only the crop footprint and
        # does zero FLOPs -- strictly better than identity-matmuls over the full plane.
        return lax.dynamic_slice(x, (0, 0, top, left), (N, C, th, tw))

    cdt = compute_dtype
    budget, vmem_limit = _chip_config()

    # Crop-fused bilinear weight matrices, cast to the MXU compute dtype ONCE in the wrapper.
    wy = lax.dynamic_slice(_bilinear_weight_matrix(H, Hn), (top, 0), (th, H)).astype(cdt)   # (th, H)
    wxT = lax.dynamic_slice(_bilinear_weight_matrix(W, Wn), (left, 0), (tw, W)).T.astype(cdt)  # (W, tw)

    NC = N * C
    img = x.reshape(NC, H, W)
    in_item = x.dtype.itemsize
    cdt_item = jnp.dtype(cdt).itemsize
    out_dtype = x.dtype
    is_int_out = jnp.issubdtype(out_dtype, jnp.integer)

    # Contraction order chosen by total FLOPs (not intermediate size).
    w_first = H * tw * (W + th) <= th * W * (H + tw)
    i0, i1 = (H, tw) if w_first else (th, W)        # intermediate plane dims

    # --- Plane batch B per grid step, from a tile-padding-aware VMEM budget ---------------
    per_plane = (
        2 * _vmem_tile_bytes(H, W, in_item)         # double-buffered input block
        + 2 * _vmem_tile_bytes(th, tw, in_item)     # double-buffered output block
        + _vmem_tile_bytes(H, W, cdt_item)          # cast copy of the input plane
        + _vmem_tile_bytes(th, H, cdt_item)         # broadcast Wy (per plane)
        + _vmem_tile_bytes(W, tw, cdt_item)         # broadcast Wx^T (per plane)
        + _vmem_tile_bytes(i0, i1, 4)               # f32 intermediate
        + _vmem_tile_bytes(i0, i1, cdt_item)        # its compute-dtype copy
        + _vmem_tile_bytes(th, tw, 4)               # f32 result before the output cast
    )
    fixed = 2 * (_vmem_tile_bytes(th, H, cdt_item) + _vmem_tile_bytes(W, tw, cdt_item))
    usable = max(0, budget - fixed)
    # Hard cap 128 bounds per-step batched-matmul count / code size; VMEM usually binds first.
    b_cap = max(1, min(usable // per_plane, NC, 128))
    n_steps = _cdiv(NC, b_cap)
    if NC > 1:
        n_steps = max(n_steps, 2)       # >=2 grid steps: pipeline overlap + v7x megacore sharding
    B = _cdiv(NC, n_steps)
    grid = _cdiv(NC, B)                 # B need not divide NC; boundary block is partial

    def kernel(wy_ref, wx_ref, img_ref, out_ref):
        img_b = img_ref[...].astype(cdt)                           # (B, H, W)
        # Broadcast the (already compute-dtype) weights across the plane batch so both stages
        # are single batched dot_generals (shared batch dim), not B unrolled tiny matmuls.
        wy_b = jnp.broadcast_to(wy_ref[...], (B, th, H))
        wx_b = jnp.broadcast_to(wx_ref[...], (B, W, tw))
        bdims = ((0,), (0,))
        if w_first:
            tmp = lax.dot_general(img_b, wx_b, (((2,), (1,)), bdims),
                                  preferred_element_type=jnp.float32)       # (B, H, tw)
            res = lax.dot_general(wy_b, tmp.astype(cdt), (((2,), (1,)), bdims),
                                  preferred_element_type=jnp.float32)       # (B, th, tw)
        else:
            tmp = lax.dot_general(wy_b, img_b, (((2,), (1,)), bdims),
                                  preferred_element_type=jnp.float32)       # (B, th, W)
            res = lax.dot_general(tmp.astype(cdt), wx_b, (((2,), (1,)), bdims),
                                  preferred_element_type=jnp.float32)       # (B, th, tw)
        if is_int_out:
            info = jnp.iinfo(out_dtype)
            res = jnp.clip(jnp.round(res), float(info.min), float(info.max))
        out_ref[...] = res.astype(out_dtype)

    flops_per_plane = (H * W * tw + th * H * tw) if w_first else (th * H * W + th * W * tw)
    cost = pl.CostEstimate(
        flops=2 * NC * flops_per_plane, transcendentals=0,
        bytes_accessed=NC * (H * W + th * tw) * in_item + (th * H + W * tw) * cdt_item)

    cp_kwargs = dict(dimension_semantics=("parallel",))   # plane axis shards across v7x TCs
    if vmem_limit is not None:
        cp_kwargs["vmem_limit_bytes"] = vmem_limit

    out = pl.pallas_call(
        kernel,
        out_shape=jax.ShapeDtypeStruct((NC, th, tw), out_dtype),
        grid_spec=pltpu.PrefetchScalarGridSpec(
            num_scalar_prefetch=0,
            grid=(grid,),
            in_specs=[
                pl.BlockSpec((th, H), lambda i: (0, 0)),        # Wy   (shared across steps)
                pl.BlockSpec((W, tw), lambda i: (0, 0)),        # Wx^T (shared across steps)
                pl.BlockSpec((B, H, W), lambda i: (i, 0, 0)),   # B planes per step
            ],
            out_specs=pl.BlockSpec((B, th, tw), lambda i: (i, 0, 0)),
        ),
        compiler_params=pltpu.CompilerParams(**cp_kwargs),
        cost_estimate=cost,
    )(wy, wxT, img)

    return out.reshape(N, C, th, tw)


def _reference(x, target_size, key):
    """Pure-JAX f32 reference (same math, same RNG) used to sanity-check the kernel."""
    th, tw = int(target_size[0]), int(target_size[1])
    N, C, H, W = x.shape
    Hn, Wn = _resized_shape(H, W, th, tw)
    top, left = _crop_offsets(Hn, Wn, th, tw, key)
    if Hn == H and Wn == W:
        return lax.dynamic_slice(x, (0, 0, top, left), (N, C, th, tw))
    wy = lax.dynamic_slice(_bilinear_weight_matrix(H, Hn), (top, 0), (th, H))
    wx = lax.dynamic_slice(_bilinear_weight_matrix(W, Wn), (left, 0), (tw, W))
    out = jnp.einsum("th,nchw,kw->nctk", wy, x.astype(jnp.float32), wx)
    return out.astype(x.dtype)


if __name__ == "__main__":
    key = jax.random.PRNGKey(0)
    k_img, k_crop = jax.random.split(key)
    target_size = (12, 10)

    # Resize path: 8x8 < target (12, 10) -> smaller edge resized to 12 -> (12, 12)
    # -> random crop to (12, 10).  Exercises the Pallas batched-matmul kernel.
    x = jax.random.normal(k_img, (2, 4, 8, 8), dtype=jnp.float32)
    out = jax.block_until_ready(resize_and_crop(x, target_size, k_crop))
    assert out.shape == (2, 4, 12, 10), out.shape
    assert out.dtype == x.dtype
    ref = jax.block_until_ready(_reference(x, target_size, k_crop))
    np.testing.assert_allclose(np.asarray(out), np.asarray(ref), rtol=3e-2, atol=3e-2)

    # No-resize path: 16x16 already covers (12, 10) -> matmul-free windowed crop.
    x2 = jax.random.normal(k_img, (2, 4, 16, 16), dtype=jnp.float32)
    out2 = jax.block_until_ready(resize_and_crop(x2, target_size, k_crop))
    assert out2.shape == (2, 4, 12, 10), out2.shape
    ref2 = jax.block_until_ready(_reference(x2, target_size, k_crop))
    np.testing.assert_allclose(np.asarray(out2), np.asarray(ref2), rtol=0, atol=0)

    print("KERNEL_OK")
</pallas_src>

<mosaic_0001>
module attributes {stable_mosaic.version = 11 : i64} {
  func.func @kernel(%arg0: i32, %arg1: memref<12x8xbf16, #tpu.memory_space<vmem>>, %arg2: memref<8x10xbf16, #tpu.memory_space<vmem>>, %arg3: memref<4x8x8xf32, #tpu.memory_space<vmem>>, %arg4: memref<4x12x10xf32, #tpu.memory_space<vmem>>) attributes {dimension_semantics = [#tpu.dimension_semantics<parallel>], iteration_bounds = array<i64: 2>, scalar_prefetch = 0 : i64, scratch_operands = 0 : i64, tpu.core_type = #tpu.core_type<tc>, window_params = [{pipeline_mode = #tpu.pipeline_mode<synchronous>, transform_indices = @transform_0, window_bounds = array<i64: 12, 8>}, {pipeline_mode = #tpu.pipeline_mode<synchronous>, transform_indices = @transform_1, window_bounds = array<i64: 8, 10>}, {transform_indices = @transform_2, window_bounds = array<i64: 4, 8, 8>}, {transform_indices = @transform_3, window_bounds = array<i64: 4, 12, 10>}]} {
    %c0 = arith.constant 0 : index
    %c0_0 = arith.constant 0 : index
    %c0_1 = arith.constant 0 : index
    %0 = vector.load %arg3[%c0, %c0_0, %c0_1] : memref<4x8x8xf32, #tpu.memory_space<vmem>>, vector<4x8x8xf32>
    %1 = arith.truncf %0 : vector<4x8x8xf32> to vector<4x8x8xbf16>
    %c0_2 = arith.constant 0 : index
    %c0_3 = arith.constant 0 : index
    %2 = vector.load %arg1[%c0_2, %c0_3] : memref<12x8xbf16, #tpu.memory_space<vmem>>, vector<12x8xbf16>
    %3 = vector.shape_cast %2 : vector<12x8xbf16> to vector<1x12x8xbf16>
    %4 = vector.broadcast %3 : vector<1x12x8xbf16> to vector<4x12x8xbf16>
    %c0_4 = arith.constant 0 : index
    %c0_5 = arith.constant 0 : index
    %5 = vector.load %arg2[%c0_4, %c0_5] : memref<8x10xbf16, #tpu.memory_space<vmem>>, vector<8x10xbf16>
    %6 = vector.shape_cast %5 : vector<8x10xbf16> to vector<1x8x10xbf16>
    %7 = vector.broadcast %6 : vector<1x8x10xbf16> to vector<4x8x10xbf16>
    %cst = arith.constant dense<0.000000e+00> : vector<4x8x10xf32>
    %8 = tpu.matmul %1, %7, %cst {dimension_numbers = #tpu.dot_dimension_numbers<[2], [1], [1], [2], [0, 0, 0, 1, 1, 2], [0], [0]>} : vector<4x8x8xbf16>, vector<4x8x10xbf16>, vector<4x8x10xf32> -> vector<4x8x10xf32>
    %9 = arith.truncf %8 : vector<4x8x10xf32> to vector<4x8x10xbf16>
    %cst_6 = arith.constant dense<0.000000e+00> : vector<4x12x10xf32>
    %10 = tpu.matmul %4, %9, %cst_6 {dimension_numbers = #tpu.dot_dimension_numbers<[2], [1], [1], [2], [0, 0, 0, 1, 1, 2], [0], [0]>} : vector<4x12x8xbf16>, vector<4x8x10xbf16>, vector<4x12x10xf32> -> vector<4x12x10xf32>
    %c0_7 = arith.constant 0 : index
    %c0_8 = arith.constant 0 : index
    %c0_9 = arith.constant 0 : index
    %11 = vector.load %arg4[%c0_7, %c0_8, %c0_9] : memref<4x12x10xf32, #tpu.memory_space<vmem>>, vector<4x12x10xf32>
    tpu.vector_store %arg4[%c0_7, %c0_8, %c0_9], %10 {strides = array<i32>} : memref<4x12x10xf32, #tpu.memory_space<vmem>>, vector<4x12x10xf32>,
    return
  }
  func.func @transform_0(%arg0: i32) -> (i32, i32) {
    %c0_i32 = arith.constant 0 : i32
    %c0_i32_0 = arith.constant 0 : i32
    %c0_i32_1 = arith.constant 0 : i32
    return %c0_i32, %c0_i32_0 : i32, i32
  }
  func.func @transform_1(%arg0: i32) -> (i32, i32) {
    %c0_i32 = arith.constant 0 : i32
    %c0_i32_0 = arith.constant 0 : i32
    %c0_i32_1 = arith.constant 0 : i32
    return %c0_i32, %c0_i32_0 : i32, i32
  }
  func.func @transform_2(%arg0: i32) -> (i32, i32, i32) {
    %c0_i32 = arith.constant 0 : i32
    %c0_i32_0 = arith.constant 0 : i32
    %c0_i32_1 = arith.constant 0 : i32
    return %arg0, %c0_i32, %c0_i32_0 : i32, i32, i32
  }
  func.func @transform_3(%arg0: i32) -> (i32, i32, i32) {
    %c0_i32 = arith.constant 0 : i32
    %c0_i32_0 = arith.constant 0 : i32
    %c0_i32_1 = arith.constant 0 : i32
    return %arg0, %c0_i32, %c0_i32_0 : i32, i32, i32
  }
}

</mosaic_0001>

<bundles_post_ra>
// kernel: tpu_custom_call.1
= control target key start
LH: loop header
LB: loop body
LE: loop exit
PB: predicated region body
PF: predicated region fallthrough
CT: control target
= control target key end

     0   :  { %8 = vsyncpa [#allocation3], 0  ;;  %s1008_s0 = inlined_call_operand.vmem [shape: bf16[12,8], index: 0, kind: input, shape index: {}]   ;;  %s1009_s1 = inlined_call_operand.vmem [shape: bf16[8,10], index: 1, kind: input, shape index: {}]   ;;  %s1010_s2 = inlined_call_operand.hbm [shape: f32[8,8,8], index: 2, kind: input, shape index: {}]   ;;  %s1011_s3 = inlined_call_operand.vmem [shape: f32[8,12,10], index: 3, kind: output, shape index: {}]  }
   0x1   :  { %10 = vsyncpa [#allocation3 + $0x1], 0  ;;  %s873_s12 = smov 0   ;;  %s875_s13 = smov 0  }
   0x2   :  { %s877_s14 = smov 0   ;;  %s879_s15 = smov 0  }
   0x3 LB: > { %s651_s16 = sadd.s32 4294967295, %s846_s15   ;;  %s893_s17 = sadd.s32 1, %s846_s15   ;;  %s846_s15 = sphi %s879_s15, %s1020_s15   ;;  %s842_s14 = sphi %s877_s14, %s1019_s14   ;;  %s838_s13 = sphi %s875_s13, %s1018_s13   ;;  %s834_s12 = sphi %s873_s12, %s1017_s12  }
   0x4   : > { %s62_s18 = ssub.s32 %s846_s15, %s893_s17  ;;  %s65_s19 = sadd.s32 1, %s842_s14 }
   0x5   : > { %p63_p0 = scmp.eq.s32.totalorder %s62_s18, 0  ;;  %p72_p1 = scmp.ne.s32.totalorder %s842_s14, %s838_s13 }
   0x6   : > { %p73_p2 = scmp.eq.s32.totalorder %s846_s15, 0  ;;  %p78_p3 = scmp.ne.s32.totalorder %s838_s13, %s834_s12 }
   0x7   : > { %s903_s20 = scalar_select %p63_p0, %s842_s14, %s65_s19  }
   0x8   : > { %p74_p4 = por %p73_p2, %p72_p1  ;;  %p79_p5 = scmp.eq.s32.totalorder %s651_s16, 0 }
   0x9   : > { %p746_p6 = scmp.lt.s32.totalorder %s846_s15, 2  ;;  %s134_s22 = sand.u32 1, %s842_s14  }
   0xa   : > { %p908_p7 = por %p79_p5, %p78_p3  ;;  %s655_s23 = sshll.u32 %s134_s22, 5 }
   0xb   : > { %s674_s24 = sshll.u32 %s846_s15, 9  ;;  %s138_s28 = scalar_lea.vmem [#allocation2], %s655_s23 }
   0xc   : > { %s1013_s21 = scalar_select %p908_p7, 1, 0 }
   0xd   : > { %s917_s27 = scalar_lea.hbm %s1010_s2, %s674_s24  ;;  %s145_s29 = sshll.u32 %s138_s28, 4  ;;  %s919_s29 = int_to_ptr.vmem [resolvable:$true] %s145_s29 }
   0xe   : > { %p921_p8 = pnand %p746_p6, %p74_p4  ;;  %s926_s4 = scalar_lea.sflag [#allocation3], %s134_s22 }
   0xf   : > { %s784_s5 = scalar_lea.hbm %s917_s27, 512  ;;  %s789_s8 = scalar_lea.hbm %s1010_s2, 1024 }
  0x10   : > { %p785_p10 = scmp.ne.s32.totalorder %s917_s27, %s784_s5  ;;  %p786_p11 = pneg %p921_p8 }
  0x11   : > { %p790_p0 = scmp.lt.s32.totalorder %s917_s27, %s1010_s2  ;;  %p791_p1 = scmp.lt.s32.totalorder %s789_s8, %s784_s5 }
  0x12   : > { %p787_p12 = pnand %p786_p11, %p785_p10 }
  0x13   : > { %p792_p2 = por %p791_p1, %p790_p0 }
  0x14   : > { %p788_p13 = pneg %p787_p12 }
  0x16   : > { %p793_p3 = pnand %p792_p2, %p788_p13 }
  0x18   : > { %796 = shalt.err (!%p793_p3)
}
  0x19   : > { %s797_s11 = scalar_lea.vmem %s919_s29, 512  ;;  %s848_s12 = smov [#allocation2]  }
  0x1a   : > { %p798_p4 = scmp.ne.s32.totalorder %s919_s29, %s797_s11  ;;  %s802_s18 = sshll.u32 %s848_s12, 4  ;;  %s803_s18 = int_to_ptr.vmem [resolvable:$false] %s802_s18 }
  0x1b   : > { %s804_s19 = scalar_lea.vmem %s803_s18, 1024  ;;  %p805_p10 = scmp.lt.s32.totalorder %s919_s29, %s803_s18 }
  0x1c   : > { %p800_p5 = pnand %p798_p4, %p786_p11  ;;  %p806_p12 = scmp.lt.s32.totalorder %s804_s19, %s797_s11 }
  0x1e   : > { %p801_p6 = pneg %p800_p5  ;;  %p807_p9 = por %p806_p12, %p805_p10 }
  0x20   : > { %p808_p7 = pnand %p807_p9, %p801_p6 }
  0x22   : > { %811 = shalt.err (!%p808_p7)
}
  0x23   : > { %s849_s22 = smov 128   ;;  %s850_s23 = smov 8  }
  0x24   : > { %745 = dma.hbm_to_vmem [thread:$0]  (!%p921_p8), %s917_s27, 512, %s919_s29, %s926_s4, %s849_s22, %s849_s22, %s850_s23  }
  0x25   : > { %p153_p11 = scmp.lt.s32.totalorder %s846_s15, 3  ;;  %p1015_p13 = scmp.ge.s32.totalorder %s846_s15, 1 }
  0x27   : > { %p154_p0 = pnand %p1015_p13, %p153_p11 }
  0x28   : > { %s159_s24 = sand.u32 (!%p154_p0), 1, %s838_s13   ;;  %p1016_p7 = scmp.ne.s32.totalorder (!%p154_p0), %s1013_s21, 0 }
  0x29   : > { %157 = sbr.rel (%p154_p0) target bundleno = 459 (0x1cb), region = 32  ;;  %s659_s25 = sshll.u32 (!%p154_p0), %s159_s24, 5 }
  0x2a   : > { %s160_s26 = scalar_lea.sflag (!%p154_p0), [#allocation3], %s159_s24  ;;  %s163_s28 = scalar_lea.vmem (!%p154_p0), [#allocation2], %s659_s25 }
  0x2e   : > { %829 = dma.done.wait (%p1016_p7), %s160_s26, 512  }
  0x2f   : > { %831 = vsyncadd (%p1016_p7), %s160_s26, 4294966784  ;;  %v851_v0 = vmov 0.0   ;;  %vm852_vm0 = vmmov 0   ;;  %vm211_vm1 = vcmask 1043456   ;;  %v206_v1 = vld [vmem:[%s1009_s1] sm:$0xf] }
  0x30   : > { %692 = vmatprep.subr.bf16.mxu0 %v851_v0  ;;  %698 = vmatprep.subr.bf16.mxu1 %v851_v0  ;;  %v196_v2 = vld [vmem:[%s163_s28] sm:$0xff]  ;;  %v197_v3 = vld [vmem:[%s163_s28 + $0x8] sm:$0xff]  ;;  %v213_v4 = vsel %vm211_vm1, %v206_v1, 0  ;;  %vm207_vm2 = vcmask 64512   ;;  %v198_v7 = vld [vmem:[%s163_s28 + $0x10] sm:$0xff]  ;;  %s660_s4 = sshll.u32 %s651_s16, 2 }
  0x31   : > { %694 = vmatprep.mubr.msk.bf16.mxu0 %vm852_vm0, %v851_v0  ;;  %700 = vmatprep.mubr.msk.bf16.mxu1 %vm852_vm0, %v851_v0  ;;  %v200_v5 = vpack.c.bf16 %v196_v2, %v196_v2  ;;  %v201_v6 = vpack.c.bf16 %v197_v3, %v197_v3  ;;  %v199_v8 = vld [vmem:[%s163_s28 + $0x18] sm:$0xff]  ;;  %v202_v9 = vpack.c.bf16 %v198_v7, %v198_v7  ;;  %v783_v19 = vld [vmem:[%s1008_s0] sm:$0x3f]   ;;  %p189_p8 = scmp.lt.s32.totalorder %s660_s4, 7  ;;  %vm572_vm3 = vcmask 80896  }
  0x32   : > { %693 = vmatpush3.bf16.msra.mxu0 %v213_v4  ;;  %699 = vmatpush3.bf16.msra.mxu1 %v213_v4  ;;  %v203_v10 = vpack.c.bf16 %v199_v8, %v199_v8  ;;  %vm574_vm4 = vcmask 76800  }
  0x33   : > { %704 = vmatprep.subr.bf16.mxu0 %v851_v0  ;;  %710 = vmatprep.subr.bf16.mxu1 %v851_v0  ;;  %s1022_s4 = smov (!%p189_p8, %s660_s4), 7 }
  0x34   : > { %s675_s5 = sshll.u32 %s1022_s4, 4 }
  0x35   : > { %695 = vmatmul.mubr.msk.bf16.vlgmr.msra.gmra.mxu0 %vm207_vm2, %v200_v5  ;;  %701 = vmatmul.mubr.msk.bf16.vlgmr.msra.gmra.mxu1 %vm207_vm2, %v201_v6  ;;  %s193_s8 = scalar_lea.vmem %s1011_s3, %s675_s5 }
  0x36   : > { %705 = vmatpush3.bf16.msra.mxu0 %v213_v4  ;;  %711 = vmatpush3.bf16.msra.mxu1 %v213_v4 }
  0x37   : > { %706 = vmatprep.mubr.msk.bf16.mxu0 %vm852_vm0, %v851_v0  ;;  %712 = vmatprep.mubr.msk.bf16.mxu1 %vm852_vm0, %v851_v0 }
  0x38   : > { %716 = vmatprep.subr.bf16.mxu0 %v851_v0  ;;  %722 = vmatprep.subr.bf16.mxu1 %v851_v0 }
  0x3d   : > { %707 = vmatmul.mubr.msk.bf16.vlgmr.msra.gmra.mxu0 %vm207_vm2, %v202_v9  ;;  %713 = vmatmul.mubr.msk.bf16.vlgmr.msra.gmra.mxu1 %vm207_vm2, %v203_v10 }
  0x3e   : > { %718 = vmatprep.mubr.msk.bf16.mxu0 %vm852_vm0, %v851_v0  ;;  %724 = vmatprep.mubr.msk.bf16.mxu1 %vm852_vm0, %v851_v0 }
  0xf5   : > { %v249_v11 = vpop.f32.mrf.mxu0  ;;  %v292_v12 = vpop.f32.mrf.mxu1 }
  0xf6   : > { %v384_v13 = vpack.c.bf16 %v249_v11, %v249_v11  ;;  %v385_v14 = vpack.c.bf16 %v292_v12, %v292_v12 }
  0xf7   : > { %v696_v15 = vpop.f32.mrf.mxu0  ;;  %v702_v16 = vpop.f32.mrf.mxu1 }
  0xf8   : > { %v397_v17 = vsel %vm211_vm1, %v384_v13, 0  ;;  %v441_v18 = vsel %vm211_vm1, %v385_v14, 0 }
  0xf9   : > { %v252_v20 = vpop.f32.mrf.mxu0  ;;  %v295_v21 = vpop.f32.mrf.mxu1  ;;  %717 = vmatpush3.bf16.msra.mxu0 %v397_v17  ;;  %723 = vmatpush3.bf16.msra.mxu1 %v441_v18 }
  0xfa   : > { %728 = vmatprep.subr.bf16.mxu0 %v851_v0  ;;  %734 = vmatprep.subr.bf16.mxu1 %v851_v0 }
  0xfb   : > { %v697_v22 = vpop.f32.mrf.mxu0  ;;  %v703_v23 = vpop.f32.mrf.mxu1 }
  0xfc   : > { %719 = vmatmul.mubr.msk.bf16.vlgmr.msra.gmra.mxu0 %vm207_vm2, %v783_v19  ;;  %725 = vmatmul.mubr.msk.bf16.vlgmr.msra.gmra.mxu1 %vm207_vm2, %v783_v19 }
  0xfd   : > { %v335_v24 = vpop.f32.mrf.mxu0  ;;  %v378_v25 = vpop.f32.mrf.mxu1  ;;  %730 = vmatprep.mubr.msk.bf16.mxu0 %vm852_vm0, %v851_v0  ;;  %736 = vmatprep.mubr.msk.bf16.mxu1 %vm852_vm0, %v851_v0 }
  0xfe   : > { %v386_v26 = vpack.c.bf16 %v335_v24, %v335_v24  ;;  %v387_v27 = vpack.c.bf16 %v378_v25, %v378_v25 }
  0xff   : > { %v708_v28 = vpop.f32.mrf.mxu0  ;;  %v714_v29 = vpop.f32.mrf.mxu1 }
 0x100   : > { %v485_v30 = vsel %vm211_vm1, %v386_v26, 0  ;;  %v529_v31 = vsel %vm211_vm1, %v387_v27, 0 }
 0x101   : > { %v338_v32 = vpop.f32.mrf.mxu0  ;;  %v381_v33 = vpop.f32.mrf.mxu1  ;;  %729 = vmatpush3.bf16.msra.mxu0 %v485_v30  ;;  %735 = vmatpush3.bf16.msra.mxu1 %v529_v31 }
 0x103   : > { %v709_v34 = vpop.f32.mrf.mxu0  ;;  %v715_v35 = vpop.f32.mrf.mxu1 }
 0x104   : > { %731 = vmatmul.mubr.msk.bf16.vlgmr.msra.gmra.mxu0 %vm207_vm2, %v783_v19  ;;  %737 = vmatmul.mubr.msk.bf16.vlgmr.msra.gmra.mxu1 %vm207_vm2, %v783_v19 }
 0x1bc   : > { %v433_v36 = vpop.f32.mrf.mxu0  ;;  %v477_v37 = vpop.f32.mrf.mxu1 }
 0x1bd   : > { %573 = vst.msk [vmem:[%s193_s8] sm:$0xff] %vm572_vm3, %v433_v36  ;;  %576 = vst.msk [vmem:[%s193_s8 + $0x10] sm:$0xff] %vm572_vm3, %v477_v37 }
 0x1be   : > { %v720_v38 = vpop.f32.mrf.mxu0  ;;  %v726_v39 = vpop.f32.mrf.mxu1 }
 0x1c0   : > { %v436_v40 = vpop.f32.mrf.mxu0  ;;  %v480_v41 = vpop.f32.mrf.mxu1 }
 0x1c1   : > { %575 = vst.msk [vmem:[%s193_s8 + $0x8] sm:$0xf] %vm574_vm4, %v436_v40  ;;  %577 = vst.msk [vmem:[%s193_s8 + $0x18] sm:$0xf] %vm574_vm4, %v480_v41 }
 0x1c2   : > { %v721_v42 = vpop.f32.mrf.mxu0  ;;  %v727_v43 = vpop.f32.mrf.mxu1 }
 0x1c4   : > { %v521_v44 = vpop.f32.mrf.mxu0  ;;  %v565_v45 = vpop.f32.mrf.mxu1 }
 0x1c5   : > { %578 = vst.msk [vmem:[%s193_s8 + $0x20] sm:$0xff] %vm572_vm3, %v521_v44  ;;  %580 = vst.msk [vmem:[%s193_s8 + $0x30] sm:$0xff] %vm572_vm3, %v565_v45 }
 0x1c6   : > { %v732_v46 = vpop.f32.mrf.mxu0  ;;  %v738_v47 = vpop.f32.mrf.mxu1 }
 0x1c8   : > { %v524_v48 = vpop.f32.mrf.mxu0  ;;  %v568_v49 = vpop.f32.mrf.mxu1 }
 0x1c9   : > { %579 = vst.msk [vmem:[%s193_s8 + $0x28] sm:$0xf] %vm574_vm4, %v524_v48  ;;  %581 = vst.msk [vmem:[%s193_s8 + $0x38] sm:$0xf] %vm574_vm4, %v568_v49 }
 0x1ca   : > { %v733_v50 = vpop.f32.mrf.mxu0  ;;  %v739_v51 = vpop.f32.mrf.mxu1 }
 0x1cb PF: > { %p13_p9 = scmp.ge.s32.totalorder %s893_s17, 4   ;;  %s1017_s12 = smov %s838_s13 }
 0x1cc   : > { %s1018_s13 = smov %s842_s14  ;;  %s1019_s14 = smov %s903_s20 }
 0x1cd   : > { %s1020_s15 = smov %s893_s17  ;;  %15 = sbr.rel (!%p13_p9) target bundleno = 3 (0x3), region = 72 }
 0x1d2   :  { %606 = vsyncpa [#allocation3], 1 }
 0x1d3   :  { %608 = vsyncpa [#allocation3 + $0x1], 1 }

</bundles_post_ra>
